<compile_context>
chip_gen: v7x
topology: tpu7x:2x2x1
jax: 0.10.0
libtpu: 0.0.40
codegen_flags: <defaults>
</compile_context>

<pallas_src>
from functools import partial

import jax
import jax.numpy as jnp
import numpy as np
from jax.experimental import pallas as pl
from jax.experimental.pallas import tpu as pltpu


def _round_up(x: int, m: int) -> int:
    return ((x + m - 1) // m) * m


def _frontend_kernel(x_ref, w_ref, pb_ref, o_ref, *, embed_scale, mxu_dtype):
    # x_ref:  (1, TQ, D_in)    one row-tile of one batch element
    # w_ref:  (D_in, D_model)  pre_linear weight (resident, constant index_map)
    # pb_ref: (TQ, D_model)    pos_embed + bias, pre-folded at init time
    # o_ref:  (1, TQ, D_model)
    x = x_ref[0]                                              # (TQ, D_in)
    if embed_scale != 1.0:
        # Static Python branch: default config has embed_scale == 1.0, so the
        # full-tile VPU multiply is skipped entirely in the common case.
        x = x * embed_scale
    w = w_ref[...]
    if mxu_dtype is not None:
        # Feed the MXU its fast dtype (bf16); accumulate in f32 below.
        if x.dtype != mxu_dtype:
            x = x.astype(mxu_dtype)
        if w.dtype != mxu_dtype:
            w = w.astype(mxu_dtype)
    y = jnp.dot(x, w, preferred_element_type=jnp.float32)     # (TQ, D_model) f32
    y = y + pb_ref[...].astype(jnp.float32)                   # bias + positions, one add
    o_ref[0] = y.astype(o_ref.dtype)
    # TODO(synk): dropout omitted (dropout_p == 0.0 in the default config).
    # TODO(synk): weight_normalization=True is not representable here (assumed False).


def prepare_lcm_frontend_params(weight, bias, pos_embed, param_dtype=None):
    """One-time (model-init) parameter prep — hoisted out of the forward hot path.

    Folds the pre_linear bias into the learned positional table (one fewer DMA
    stream + one fewer full-tile add per grid step) and optionally casts both
    params to the MXU compute dtype (e.g. bf16).
    """
    pos_plus_bias = pos_embed.astype(jnp.float32) + bias.astype(jnp.float32)[None, :]
    if param_dtype is not None:
        return weight.astype(param_dtype), pos_plus_bias.astype(param_dtype)
    return weight, pos_plus_bias


def lcm_frontend_forward(seqs, weight, pos_plus_bias, padding_mask=None,
                         embed_scale=1.0, row_tile=512, mxu_dtype=None):
    """LCMFrontend.forward.

    seqs:          [B, S, D_in]     SONAR sentence embeddings
    weight:        [D_in, D_model]  pre_linear weight (x @ W layout), prepared
    pos_plus_bias: [>=S, D_model]   learned positional table with bias folded in
    Returns (out [B, S, D_model], padding_mask)  -- padding_mask passed through.

    TODO(synk): positions are implicitly 0..S-1; padding-mask-aware / state_bag
    offset positions (left padding, incremental decoding) are not implemented.
    """
    B, S, D_in = seqs.shape
    if weight.shape[0] != D_in:
        raise ValueError("weight/seqs inner-dim mismatch")
    D_model = weight.shape[1]
    if pos_plus_bias.shape[-1] != D_model:
        raise ValueError("positional table width must equal model_dim")

    if mxu_dtype is None and seqs.dtype == jnp.bfloat16:
        mxu_dtype = jnp.bfloat16   # model runs bf16 -> use the fast MXU path

    x_item = jnp.dtype(seqs.dtype).itemsize
    w_item = jnp.dtype(weight.dtype).itemsize
    pb_item = jnp.dtype(pos_plus_bias.dtype).itemsize

    # Row tile: multiple of the dtype's sublane packing (8 f32 / 16 bf16 / 32 int8).
    # 512 is safe inside v7x's 64 MiB VMEM; on v5e/v6e (128 MiB) row_tile=1024 is fine.
    sub = max(8, 32 // x_item)
    TQ = min(_round_up(max(int(row_tile), 1), sub), _round_up(S, sub))

    def footprint(tq, n_w_buf):
        return (2 * tq * D_in * x_item            # x tiles (double-buffered)
                + 2 * tq * D_model * x_item       # out tiles (double-buffered)
                + n_w_buf * D_in * D_model * w_item
                + 2 * tq * D_model * pb_item)     # pos+bias tiles

    # Shrink the row tile if the (conservative, weight double-counted) footprint
    # would exceed a ~48 MiB budget.
    while TQ > sub and footprint(TQ, 2) > (48 << 20):
        TQ = _round_up(TQ // 2, sub)

    nS = pl.cdiv(S, TQ)

    def build(single_buffer_weight):
        if single_buffer_weight:
            # Constant index_map => the weight is DMA'd once; a single buffer
            # reclaims D_in*D_model*itemsize of VMEM vs default double buffering.
            w_spec = pl.BlockSpec((D_in, D_model), lambda s, b: (0, 0),
                                  pipeline_mode=pl.Buffered(1))
            n_w_buf = 1
        else:
            w_spec = pl.BlockSpec((D_in, D_model), lambda s, b: (0, 0))
            n_w_buf = 2
        est = footprint(TQ, n_w_buf)
        # Accurate estimate + fixed headroom for Mosaic internal scratch; capped
        # comfortably below v7x's 64 MiB physical VMEM.
        vmem_limit = int(min(max(est + (8 << 20), 32 << 20), 56 << 20))
        return pl.pallas_call(
            partial(_frontend_kernel, embed_scale=float(embed_scale),
                    mxu_dtype=mxu_dtype),
            out_shape=jax.ShapeDtypeStruct((B, S, D_model), seqs.dtype),
            grid_spec=pltpu.PrefetchScalarGridSpec(
                num_scalar_prefetch=0,
                # Batch innermost: the pos+bias block index is constant across it,
                # so that tile is fetched once per row tile instead of B times.
                grid=(nS, B),
                in_specs=[
                    pl.BlockSpec((1, TQ, D_in), lambda s, b: (b, s, 0)),
                    w_spec,
                    pl.BlockSpec((TQ, D_model), lambda s, b: (s, 0)),
                ],
                out_specs=pl.BlockSpec((1, TQ, D_model), lambda s, b: (b, s, 0)),
            ),
            compiler_params=pltpu.CompilerParams(
                dimension_semantics=("parallel", "parallel"),
                vmem_limit_bytes=vmem_limit,
            ),
        )

    try:
        out = build(single_buffer_weight=True)(seqs, weight, pos_plus_bias)
    except Exception:
        # Fallback if this JAX build rejects Buffered(1) on a resident operand.
        out = build(single_buffer_weight=False)(seqs, weight, pos_plus_bias)
    return out, padding_mask


if __name__ == "__main__":
    # Small shapes consistent with the module.
    B, S = 2, 8
    sonar_embed_dim = 32   # SONAR embedding dim (tiny, synthetic)
    model_dim = 32
    embedding_std = 0.006  # SONAR_STD-like init for positional embeddings
    embed_scale = 1.0      # config.scale_embeddings = False

    key = jax.random.PRNGKey(0)
    k_seq, k_w, k_b, k_pos = jax.random.split(key, 4)

    # Input sentence embeddings (SONAR-like: ~N(0, 0.006)).
    seqs = (jax.random.normal(k_seq, (B, S, sonar_embed_dim), dtype=jnp.float32)
            * embedding_std)

    # pre_linear: kaiming_uniform-style init.
    fan_in = sonar_embed_dim
    w_bound = float(np.sqrt(1.0 / fan_in))
    weight = jax.random.uniform(k_w, (sonar_embed_dim, model_dim),
                                minval=-w_bound, maxval=w_bound, dtype=jnp.float32)
    bias = jax.random.uniform(k_b, (model_dim,),
                              minval=-w_bound, maxval=w_bound, dtype=jnp.float32)

    # LearnedPositionEncoder weight ~ N(0, embedding_std) (reset_parameters).
    pos_embed = (jax.random.normal(k_pos, (S, model_dim), dtype=jnp.float32)
                 * embedding_std)

    # Pure-JAX reference.
    ref = (embed_scale * seqs) @ weight + bias[None, None, :] + pos_embed[None, :, :]

    # ---- f32 path (exact) ----
    w_prep, pb_prep = prepare_lcm_frontend_params(weight, bias, pos_embed)
    out, _ = lcm_frontend_forward(seqs, w_prep, pb_prep,
                                  padding_mask=None, embed_scale=embed_scale)
    out = jax.block_until_ready(out)
    np.testing.assert_allclose(np.asarray(out), np.asarray(ref), rtol=1e-5, atol=1e-5)

    # ---- bf16 MXU path (params + activations in bf16, f32 accumulate) ----
    w16, pb16 = prepare_lcm_frontend_params(weight, bias, pos_embed,
                                            param_dtype=jnp.bfloat16)
    out16, _ = lcm_frontend_forward(seqs.astype(jnp.bfloat16), w16, pb16,
                                    padding_mask=None, embed_scale=embed_scale)
    out16 = jax.block_until_ready(out16)
    np.testing.assert_allclose(np.asarray(out16.astype(jnp.float32)), np.asarray(ref),
                               rtol=5e-2, atol=1e-2)

    print("KERNEL_OK")
</pallas_src>

<mosaic_0001>
module attributes {stable_mosaic.version = 11 : i64} {
  func.func @_frontend_kernel(%arg0: i32, %arg1: i32, %arg2: memref<1x8x32xf32, #tpu.memory_space<vmem>>, %arg3: memref<32x32xf32, #tpu.memory_space<vmem>>, %arg4: memref<8x32xf32, #tpu.memory_space<vmem>>, %arg5: memref<1x8x32xf32, #tpu.memory_space<vmem>>) attributes {dimension_semantics = [#tpu.dimension_semantics<parallel>, #tpu.dimension_semantics<parallel>], iteration_bounds = array<i64: 1, 2>, scalar_prefetch = 0 : i64, scratch_operands = 0 : i64, tpu.core_type = #tpu.core_type<tc>, window_params = [{transform_indices = @transform_0, window_bounds = array<i64: 1, 8, 32>}, {pipeline_mode = #tpu.pipeline_mode<synchronous>, transform_indices = @transform_1, window_bounds = array<i64: 32, 32>}, {transform_indices = @transform_2, window_bounds = array<i64: 8, 32>}, {transform_indices = @transform_3, window_bounds = array<i64: 1, 8, 32>}]} {
    %c0 = arith.constant 0 : index
    %c0_0 = arith.constant 0 : index
    %c0_1 = arith.constant 0 : index
    %0 = vector.load %arg2[%c0, %c0_0, %c0_1] : memref<1x8x32xf32, #tpu.memory_space<vmem>>, vector<1x8x32xf32>
    %1 = vector.shape_cast %0 : vector<1x8x32xf32> to vector<8x32xf32>
    %c0_2 = arith.constant 0 : index
    %c0_3 = arith.constant 0 : index
    %2 = vector.load %arg3[%c0_2, %c0_3] : memref<32x32xf32, #tpu.memory_space<vmem>>, vector<32x32xf32>
    %cst = arith.constant dense<0.000000e+00> : vector<8x32xf32>
    %3 = tpu.matmul %1, %2, %cst {dimension_numbers = #tpu.dot_dimension_numbers<[1], [0], [0], [1], [0, 0, 1, 1], [], []>} : vector<8x32xf32>, vector<32x32xf32>, vector<8x32xf32> -> vector<8x32xf32>
    %c0_4 = arith.constant 0 : index
    %c0_5 = arith.constant 0 : index
    %4 = vector.load %arg4[%c0_4, %c0_5] : memref<8x32xf32, #tpu.memory_space<vmem>>, vector<8x32xf32>
    %5 = arith.addf %3, %4 : vector<8x32xf32>
    %c0_6 = arith.constant 0 : index
    %c0_7 = arith.constant 0 : index
    %c0_8 = arith.constant 0 : index
    %6 = vector.load %arg5[%c0_6, %c0_7, %c0_8] : memref<1x8x32xf32, #tpu.memory_space<vmem>>, vector<1x8x32xf32>
    %7 = vector.shape_cast %6 : vector<1x8x32xf32> to vector<8x32xf32>
    %8 = vector.shape_cast %5 : vector<8x32xf32> to vector<1x8x32xf32>
    tpu.vector_store %arg5[%c0_6, %c0_7, %c0_8], %8 {strides = array<i32>} : memref<1x8x32xf32, #tpu.memory_space<vmem>>, vector<1x8x32xf32>,
    return
  }
  func.func @transform_0(%arg0: i32, %arg1: i32) -> (i32, i32, i32) {
    %c0_i32 = arith.constant 0 : i32
    %c0_i32_0 = arith.constant 0 : i32
    return %arg1, %arg0, %c0_i32 : i32, i32, i32
  }
  func.func @transform_1(%arg0: i32, %arg1: i32) -> (i32, i32) {
    %c0_i32 = arith.constant 0 : i32
    %c0_i32_0 = arith.constant 0 : i32
    %c0_i32_1 = arith.constant 0 : i32
    return %c0_i32, %c0_i32_0 : i32, i32
  }
  func.func @transform_2(%arg0: i32, %arg1: i32) -> (i32, i32) {
    %c0_i32 = arith.constant 0 : i32
    %c0_i32_0 = arith.constant 0 : i32
    return %arg0, %c0_i32 : i32, i32
  }
  func.func @transform_3(%arg0: i32, %arg1: i32) -> (i32, i32, i32) {
    %c0_i32 = arith.constant 0 : i32
    %c0_i32_0 = arith.constant 0 : i32
    return %arg1, %arg0, %c0_i32 : i32, i32, i32
  }
}

module attributes {stable_mosaic.version = 11 : i64} {
  func.func @_frontend_kernel(%arg0: i32, %arg1: i32, %arg2: memref<1x8x32xf32, #tpu.memory_space<vmem>>, %arg3: memref<32x32xf32, #tpu.memory_space<vmem>>, %arg4: memref<8x32xf32, #tpu.memory_space<vmem>>, %arg5: memref<1x8x32xf32, #tpu.memory_space<vmem>>) attributes {dimension_semantics = [#tpu.dimension_semantics<parallel>, #tpu.dimension_semantics<parallel>], iteration_bounds = array<i64: 1, 2>, scalar_prefetch = 0 : i64, scratch_operands = 0 : i64, tpu.core_type = #tpu.core_type<tc>, window_params = [{transform_indices = @transform_0, window_bounds = array<i64: 1, 8, 32>}, {pipeline_mode = #tpu.pipeline_mode<synchronous>, transform_indices = @transform_1, window_bounds = array<i64: 32, 32>}, {transform_indices = @transform_2, window_bounds = array<i64: 8, 32>}, {transform_indices = @transform_3, window_bounds = array<i64: 1, 8, 32>}]} {
    %c0 = arith.constant 0 : index
    %c0_0 = arith.constant 0 : index
    %c0_1 = arith.constant 0 : index
    %0 = vector.load %arg2[%c0, %c0_0, %c0_1] : memref<1x8x32xf32, #tpu.memory_space<vmem>>, vector<1x8x32xf32>
    %1 = vector.shape_cast %0 : vector<1x8x32xf32> to vector<8x32xf32>
    %c0_2 = arith.constant 0 : index
    %c0_3 = arith.constant 0 : index
    %2 = vector.load %arg3[%c0_2, %c0_3] : memref<32x32xf32, #tpu.memory_space<vmem>>, vector<32x32xf32>
    %cst = arith.constant dense<0.000000e+00> : vector<8x32xf32>
    %3 = tpu.matmul %1, %2, %cst {dimension_numbers = #tpu.dot_dimension_numbers<[1], [0], [0], [1], [0, 0, 1, 1], [], []>} : vector<8x32xf32>, vector<32x32xf32>, vector<8x32xf32> -> vector<8x32xf32>
    %c0_4 = arith.constant 0 : index
    %c0_5 = arith.constant 0 : index
    %4 = vector.load %arg4[%c0_4, %c0_5] : memref<8x32xf32, #tpu.memory_space<vmem>>, vector<8x32xf32>
    %5 = arith.addf %3, %4 : vector<8x32xf32>
    %c0_6 = arith.constant 0 : index
    %c0_7 = arith.constant 0 : index
    %c0_8 = arith.constant 0 : index
    %6 = vector.load %arg5[%c0_6, %c0_7, %c0_8] : memref<1x8x32xf32, #tpu.memory_space<vmem>>, vector<1x8x32xf32>
    %7 = vector.shape_cast %6 : vector<1x8x32xf32> to vector<8x32xf32>
    %8 = vector.shape_cast %5 : vector<8x32xf32> to vector<1x8x32xf32>
    tpu.vector_store %arg5[%c0_6, %c0_7, %c0_8], %8 {strides = array<i32>} : memref<1x8x32xf32, #tpu.memory_space<vmem>>, vector<1x8x32xf32>,
    return
  }
  func.func @transform_0(%arg0: i32, %arg1: i32) -> (i32, i32, i32) {
    %c0_i32 = arith.constant 0 : i32
    %c0_i32_0 = arith.constant 0 : i32
    return %arg1, %arg0, %c0_i32 : i32, i32, i32
  }
  func.func @transform_1(%arg0: i32, %arg1: i32) -> (i32, i32) {
    %c0_i32 = arith.constant 0 : i32
    %c0_i32_0 = arith.constant 0 : i32
    %c0_i32_1 = arith.constant 0 : i32
    return %c0_i32, %c0_i32_0 : i32, i32
  }
  func.func @transform_2(%arg0: i32, %arg1: i32) -> (i32, i32) {
    %c0_i32 = arith.constant 0 : i32
    %c0_i32_0 = arith.constant 0 : i32
    return %arg0, %c0_i32 : i32, i32
  }
  func.func @transform_3(%arg0: i32, %arg1: i32) -> (i32, i32, i32) {
    %c0_i32 = arith.constant 0 : i32
    %c0_i32_0 = arith.constant 0 : i32
    return %arg1, %arg0, %c0_i32 : i32, i32, i32
  }
}

</mosaic_0001>

<bundles_post_ra>
// kernel: tpu_custom_call.1
= control target key start
LH: loop header
LB: loop body
LE: loop exit
PB: predicated region body
PF: predicated region fallthrough
CT: control target
= control target key end

     0   :  { %8 = vsyncpa [#allocation3], 0  ;;  %s1015_s0 = inlined_call_operand.hbm [shape: f32[2,8,32], index: 0, kind: input, shape index: {}]   ;;  %s1016_s1 = inlined_call_operand.hbm [shape: f32[32,32], index: 1, kind: input, shape index: {}]   ;;  %s1017_s2 = inlined_call_operand.hbm [shape: f32[8,32], index: 2, kind: input, shape index: {}]   ;;  %s1018_s3 = inlined_call_operand.hbm [shape: f32[2,8,32], index: 3, kind: output, shape index: {}]  }
   0x1   :  { %10 = vsyncpa [#allocation3 + $0x1], 0 }
   0x2   :  { %11 = vsyncpa [#allocation6], 0 }
   0x3   :  { %12 = vsyncpa [#allocation4], 0 }
   0x4   :  { %14 = vsyncpa [#allocation4 + $0x1], 0  ;;  %s765_s12 = smov 0   ;;  %s767_s13 = smov 0  }
   0x5   :  { %s769_s14 = smov 0   ;;  %s771_s15 = smov 0  }
   0x6   :  { %s773_s16 = smov 0   ;;  %s775_s17 = smov 0  }
   0x7 LB: > { %s434_s18 = sadd.s32 4294967295, %s734_s17   ;;  %s435_s19 = sadd.s32 4294967294, %s734_s17   ;;  %s734_s17 = sphi %s775_s17, %s20_s17   ;;  %s730_s16 = sphi %s773_s16, %s1040_s16   ;;  %s726_s15 = sphi %s771_s15, %s1039_s15   ;;  %s722_s14 = sphi %s769_s14, %s1038_s14   ;;  %s718_s13 = sphi %s767_s13, %s1037_s13   ;;  %s714_s12 = sphi %s765_s12, %s1036_s12  }
   0x8   : > { %p54_p0 = scmp.ne.s32.totalorder %s718_s13, %s714_s12  ;;  %p799_p1 = scmp.eq.s32.totalorder %s434_s18, 0 }
   0x9   : > { %p803_p2 = scmp.eq.s32.totalorder %s434_s18, 1  ;;  %p133_p3 = scmp.eq.s32.totalorder %s435_s19, 1 }
   0xa   : > { %s1023_s20 = scalar_select %p799_p1, 1, 0 }
   0xb   : > { %p809_p4 = por %p799_p1, %p54_p0  ;;  %p436_p5 = scmp.ge.s32.totalorder %s734_s17, 1 }
   0xc   : > { %p814_p6 = por %p133_p3, %p54_p0  ;;  %p140_p7 = scmp.lt.s32.totalorder %s734_s17, 3 }
   0xd   : > { %s1025_s22 = scalar_select %p809_p4, 1, 0 }
   0xe   : > { %s1026_s23 = scalar_select %p814_p6, 1, 0 }
   0xf   : > { %p819_p8 = pnand %p436_p5, %p140_p7  ;;  %s736_s25 = smov [#allocation5]  }
  0x10   : > { %s152_s26 = sshll.u32 %s736_s25, 4  ;;  %s737_s28 = smov [#allocation7]   ;;  %s823_s26 = int_to_ptr.vmem [resolvable:$true] %s152_s26 }
  0x11   : > { %p486_p9 = pneg %p819_p8  ;;  %s168_s29 = sshll.u32 %s737_s28, 4  ;;  %s834_s29 = int_to_ptr.vmem [resolvable:$true] %s168_s29 }
  0x12   : > { %s562_s5 = scalar_lea.hbm %s1016_s1, 512 }
  0x13   : > { %p830_p11 = pnand %p486_p9, %p799_p1  ;;  %p563_p12 = scmp.ne.s32.totalorder %s1016_s1, %s562_s5 }
  0x14   : > { %p569_p5 = scmp.lt.u32.totalorder %s562_s5, %s1016_s1 }
  0x15   : > { %p564_p13 = pneg %p830_p11 }
  0x17   : > { %p565_p0 = pnand %p564_p13, %p563_p12 }
  0x19   : > { %p566_p3 = pneg %p565_p0 }
  0x1b   : > { %p571_p7 = pnand %p569_p5, %p566_p3 }
  0x1d   : > { %574 = shalt.err (!%p571_p7)
}
  0x1e   : > { %s575_s10 = scalar_lea.vmem %s823_s26, 512  ;;  %p583_p1 = scmp.lt.s32.totalorder %s823_s26, %s823_s26 }
  0x1f   : > { %p576_p9 = scmp.ne.s32.totalorder %s823_s26, %s575_s10  ;;  %p584_p12 = scmp.lt.s32.totalorder %s575_s10, %s575_s10 }
  0x21   : > { %p578_p10 = pnand %p576_p9, %p564_p13  ;;  %p585_p0 = por %p584_p12, %p583_p1 }
  0x23   : > { %p579_p6 = pneg %p578_p10 }
  0x25   : > { %p586_p4 = pnand %p585_p0, %p579_p6 }
  0x27   : > { %589 = shalt.err (!%p586_p4)
}
  0x28   : > { %s738_s11 = smov 128   ;;  %s739_s18 = smov 8  }
  0x29   : > { %489 = dma.hbm_to_vmem [thread:$0]  (!%p830_p11), %s1016_s1, 512, %s823_s26, [#allocation6], %s738_s11, %s738_s11, %s739_s18  }
  0x2a   : > { %s590_s4 = scalar_lea.hbm %s1017_s2, 128 }
  0x2b   : > { %p591_p1 = scmp.ne.s32.totalorder %s1017_s2, %s590_s4  ;;  %p597_p10 = scmp.lt.u32.totalorder %s590_s4, %s1017_s2 }
  0x2d   : > { %p593_p4 = pnand %p591_p1, %p564_p13 }
  0x2f   : > { %p594_p6 = pneg %p593_p4 }
  0x31   : > { %p599_p3 = pnand %p597_p10, %p594_p6 }
  0x33   : > { %602 = shalt.err (!%p599_p3)
}
  0x34   : > { %s603_s26 = scalar_lea.vmem %s834_s29, 128  ;;  %p611_p12 = scmp.lt.s32.totalorder %s834_s29, %s834_s29 }
  0x35   : > { %p604_p5 = scmp.ne.s32.totalorder %s834_s29, %s603_s26  ;;  %p612_p0 = scmp.lt.s32.totalorder %s603_s26, %s603_s26 }
  0x37   : > { %p606_p7 = pnand %p604_p5, %p564_p13  ;;  %p613_p1 = por %p612_p0, %p611_p12 }
  0x39   : > { %p607_p9 = pneg %p606_p7 }
  0x3b   : > { %p614_p4 = pnand %p613_p1, %p607_p9 }
  0x3d   : > { %617 = shalt.err (!%p614_p4)
}
  0x3e   : > { %492 = dma.hbm_to_vmem [thread:$0]  (!%p830_p11), %s1017_s2, 128, %s834_s29, [#allocation6]  }
  0x3f   : > { %s29_s11 = sadd.s32 1, %s730_s16  ;;  %s41_s18 = sadd.s32 1, %s722_s14 }
  0x40   : > { %p30_p13 = scmp.ge.s32.totalorder %s29_s11, 2  ;;  %p48_p6 = scmp.ne.s32.totalorder %s722_s14, %s718_s13 }
  0x41   : > { %p49_p10 = scmp.eq.s32.totalorder %s734_s17, 0  ;;  %p503_p3 = scmp.lt.s32.totalorder %s734_s17, 2 }
  0x42   : > { %s1042_s11 = smov (%p30_p13, %s29_s11), 0  ;;  %p898_p7 = por %p803_p2, %p48_p6 }
  0x43   : > { %p50_p5 = por %p49_p10, %p48_p6  ;;  %s36_s19 = ssub.s32 %s730_s16, %s1042_s11 }
  0x44   : > { %s1029_s27 = scalar_select %p898_p7, 1, 0 }
  0x45   : > { %s179_s25 = sand.u32 1, %s722_s14   ;;  %p39_p9 = scmp.eq.s32.totalorder %s36_s19, 0 }
  0x46   : > { %s440_s29 = sshll.u32 %s179_s25, 3  ;;  %s441_s28 = sshll.u32 %s730_s16, 7 }
  0x47   : > { %s907_s30 = scalar_select %p39_p9, %s722_s14, %s41_s18  }
  0x48   : > { %s912_s6 = scalar_lea.hbm %s1015_s0, %s441_s28  ;;  %s183_s21 = scalar_lea.vmem [#allocation2], %s440_s29 }
  0x49   : > { %s191_s7 = sshll.u32 %s183_s21, 4  ;;  %p916_p2 = pnand %p503_p3, %p50_p5  ;;  %s920_s7 = int_to_ptr.vmem [resolvable:$true] %s191_s7 }
  0x4a   : > { %s180_s26 = scalar_lea.sflag [#allocation3], %s179_s25  ;;  %s618_s9 = scalar_lea.hbm %s912_s6, 128 }
  0x4b   : > { %p619_p11 = scmp.ne.s32.totalorder %s912_s6, %s618_s9  ;;  %p620_p12 = pneg %p916_p2 }
  0x4c   : > { %s623_s19 = scalar_lea.hbm %s1015_s0, 256  ;;  %p624_p4 = scmp.lt.u32.totalorder %s912_s6, %s1015_s0 }
  0x4d   : > { %p621_p0 = pnand %p620_p12, %p619_p11  ;;  %p625_p13 = scmp.lt.u32.totalorder %s623_s19, %s618_s9 }
  0x4e   : > { %p627_p10 = scmp.lt.u32.totalorder %s618_s9, %s912_s6 }
  0x4f   : > { %p622_p1 = pneg %p621_p0  ;;  %p626_p6 = por %p625_p13, %p624_p4 }
  0x51   : > { %p628_p3 = por %p627_p10, %p626_p6 }
  0x53   : > { %p629_p5 = pnand %p628_p3, %p622_p1 }
  0x55   : > { %632 = shalt.err (!%p629_p5)
}
  0x56   : > { %s633_s25 = scalar_lea.vmem %s920_s7, 128  ;;  %s740_s4 = smov [#allocation2]  }
  0x57   : > { %p634_p9 = scmp.ne.s32.totalorder %s920_s7, %s633_s25  ;;  %s638_s5 = sshll.u32 %s740_s4, 4  ;;  %s639_s5 = int_to_ptr.vmem [resolvable:$false] %s638_s5 }
  0x58   : > { %s640_s21 = scalar_lea.vmem %s639_s5, 256  ;;  %p641_p7 = scmp.lt.s32.totalorder %s920_s7, %s639_s5 }
  0x59   : > { %p636_p11 = pnand %p634_p9, %p620_p12  ;;  %p642_p4 = scmp.lt.s32.totalorder %s640_s21, %s633_s25 }
  0x5b   : > { %p637_p0 = pneg %p636_p11  ;;  %p643_p13 = por %p642_p4, %p641_p7 }
  0x5d   : > { %p644_p6 = pnand %p643_p13, %p637_p0 }
  0x5f   : > { %647 = shalt.err (!%p644_p6)
}
  0x60   : > { %496 = dma.hbm_to_vmem [thread:$0]  (!%p916_p2), %s912_s6, 128, %s920_s7, %s180_s26  }
  0x61   : > { %200 = sbr.rel (%p819_p8) target bundleno = 347 (0x15b), region = 32  ;;  %s950_s9 = sand.u32 (!%p819_p8), 1, %s718_s13  }
  0x62   : > { %s443_s10 = sshll.u32 (!%p819_p8), %s950_s9, 3  ;;  %s203_s18 = scalar_lea.sflag (!%p819_p8), [#allocation3], %s950_s9 }
  0x63   : > { %s206_s19 = scalar_lea.vmem (!%p819_p8), [#allocation2], %s443_s10  ;;  %p1031_p7 = scmp.ne.s32.totalorder (!%p819_p8), %s1025_s22, 0 }
  0x68   : > { %701 = dma.done.wait (%p1031_p7), %s203_s18, 128  }
  0x69   : > { %703 = vsyncadd (%p1031_p7), %s203_s18, 4294967168  ;;  %p1032_p12 = scmp.ne.s32.totalorder %s1023_s20, 0 }
  0x6b   : > { %705 = dma.done.wait (%p1032_p12), [#allocation6], 640  }
  0x6c   : > { %707 = vsyncadd (%p1032_p12), [#allocation6], 4294966656  ;;  %v741_v0 = vmov 0.0|0.0   ;;  %vm742_vm0 = vmmov 0   ;;  %v743_v1 = vmov 0.0   ;;  %v238_v2 = vld [vmem:[#allocation5] sm:$0xff] }
  0x6d   : > { %468 = vmatprep.subr.bf16.mxu0 %v741_v0  ;;  %465 = vmatprep.mubr.msk.f32.mxu0 %vm742_vm0, %v743_v1  ;;  %v239_v3 = vld [vmem:[#allocation5 + $0x8] sm:$0xff]  ;;  %v240_v4 = vld [vmem:[#allocation5 + $0x10] sm:$0xff]  ;;  %v241_v6 = vld [vmem:[#allocation5 + $0x18] sm:$0xff]  ;;  %vm243_vm1 = vcmask 261120   ;;  %s449_s20 = sshll.u32 %s726_s15, 7  ;;  %s236_s22 = scalar_lea.vmem [#allocation8], %s443_s10 }
  0x6e   : > { %v469_v5 = vpack.c.bf16 %v239_v3, %v238_v2  ;;  %v472_v7 = vpack.c.bf16 %v241_v6, %v240_v4  ;;  %v237_v8 = vld [vmem:[%s206_s19] sm:$0xff]  ;;  %v242_v9 = vld [vmem:[#allocation7] sm:$0xff]  ;;  %s333_s24 = sshll.u32 %s236_s22, 4  ;;  %s966_s8 = scalar_lea.hbm %s1018_s3, %s449_s20  ;;  %s968_s24 = int_to_ptr.vmem [resolvable:$true] %s333_s24 }
  0x6f   : > { %s319_s26 = scalar_lea.sflag [#allocation4], %s950_s9  ;;  %s648_s29 = scalar_lea.vmem %s968_s24, 128 }
  0x70   : > { %470 = vmatpush3.bf16.msra.mxu0 %v469_v5  ;;  %p649_p8 = scmp.ne.s32.totalorder %s968_s24, %s648_s29  ;;  %p1033_p2 = scmp.ne.s32.totalorder %s1029_s27, 0 }
  0x71   : > { %471 = vmatprep.subr.bf16.mxu0 %v741_v0  ;;  %s744_s15 = smov [#allocation8]  }
  0x72   : > { %p650_p1 = pnand %p649_p8, %p1033_p2  ;;  %s652_s28 = sshll.u32 %s744_s15, 4  ;;  %s653_s28 = int_to_ptr.vmem [resolvable:$false] %s652_s28 }
  0x73   : > { %s654_s25 = scalar_lea.vmem %s653_s28, 256  ;;  %p655_p3 = scmp.lt.s32.totalorder %s968_s24, %s653_s28 }
  0x74   : > { %473 = vmatpush3.bf16.msra.mxu0 %v472_v7  ;;  %p651_p10 = pneg %p650_p1  ;;  %p656_p5 = scmp.lt.s32.totalorder %s654_s25, %s648_s29 }
  0x76   : > { %p657_p9 = por %p656_p5, %p655_p3 }
  0x77   : > { %466 = vmatmul.mubr.msk.f32.vlgmr.msra.gmra.mrb[0].mxu0 %vm243_vm1, %v237_v8 }
  0x78   : > { %p658_p11 = pnand %p657_p9, %p651_p10 }
 0x14a   : > { %v313_v10 = vpop.f32.mrb[0].mxu0 }
 0x14b   : > { %v314_v11 = vadd.f32 %v313_v10, %v242_v9  ;;  %v467_v12 = vpop.f32.mrb[1].mxu0 }
 0x14d   : > { %317 = vst.msk [vmem:[%s236_s22] sm:$0xff] %vm243_vm1, %v314_v11 }
 0x14e   : > { %661 = shalt.err (!%p658_p11)
}
 0x14f   : > { %s662_s4 = scalar_lea.hbm %s966_s8, 128  ;;  %s666_s9 = scalar_lea.hbm %s1018_s3, 256 }
 0x150   : > { %p663_p0 = scmp.ne.s32.totalorder %s966_s8, %s662_s4  ;;  %p667_p6 = scmp.lt.u32.totalorder %s966_s8, %s1018_s3 }
 0x151   : > { %p668_p7 = scmp.lt.u32.totalorder %s666_s9, %s662_s4  ;;  %p670_p8 = scmp.lt.u32.totalorder %s662_s4, %s966_s8 }
 0x152   : > { %p664_p4 = pnand %p663_p0, %p1033_p2 }
 0x153   : > { %p669_p12 = por %p668_p7, %p667_p6 }
 0x154   : > { %p665_p13 = pneg %p664_p4 }
 0x155   : > { %p671_p1 = por %p670_p8, %p669_p12 }
 0x157   : > { %p672_p10 = pnand %p671_p1, %p665_p13 }
 0x159   : > { %675 = shalt.err (!%p672_p10)
}
 0x15a   : > { %484 = dma.vmem_to_hbm [thread:$0]  (%p1033_p2), %s968_s24, 128, %s966_s8, %s319_s26  }
 0x15b PF: > { %s345_s19 = sand.u32 1, %s714_s12   ;;  %p1034_p3 = scmp.ne.s32.totalorder %s1026_s23, 0 }
 0x15c   : > { %p1035_p5 = scmp.ge.s32.totalorder %s734_s17, 2  ;;  %s346_s20 = scalar_lea.sflag [#allocation4], %s345_s19 }
 0x15e   : > { %p498_p9 = pnand %p1035_p5, %p1034_p3 }
 0x160   : > { %709 = dma.done.wait (!%p498_p9), %s346_s20, 128  }
 0x161   : > { %711 = vsyncadd (!%p498_p9), %s346_s20, 4294967168  ;;  %s20_s17 = sadd.s32 1, %s734_s17   ;;  %s1036_s12 = smov %s718_s13 }
 0x162   : > { %p17_p11 = scmp.ge.s32.totalorder %s20_s17, 4   ;;  %s1037_s13 = smov %s722_s14 }
 0x163   : > { %s1038_s14 = smov %s907_s30  ;;  %s1039_s15 = smov %s730_s16 }
 0x164   : > { %s1040_s16 = smov %s1042_s11  ;;  %19 = sbr.rel (!%p17_p11) target bundleno = 7 (0x7), region = 86 }
 0x16b   :  { %351 = vsyncpa [#allocation3], 1 }
 0x16c   :  { %353 = vsyncpa [#allocation3 + $0x1], 1 }
 0x16d   :  { %354 = vsyncpa [#allocation6], 1 }
 0x16e   :  { %355 = vsyncpa [#allocation4], 1 }
 0x16f   :  { %357 = vsyncpa [#allocation4 + $0x1], 1 }

// kernel: tpu_custom_call.1
= control target key start
LH: loop header
LB: loop body
LE: loop exit
PB: predicated region body
PF: predicated region fallthrough
CT: control target
= control target key end

     0   :  { %8 = vsyncpa [#allocation3], 0  ;;  %s1015_s0 = inlined_call_operand.hbm [shape: f32[2,8,32], index: 0, kind: input, shape index: {}]   ;;  %s1016_s1 = inlined_call_operand.hbm [shape: f32[32,32], index: 1, kind: input, shape index: {}]   ;;  %s1017_s2 = inlined_call_operand.hbm [shape: f32[8,32], index: 2, kind: input, shape index: {}]   ;;  %s1018_s3 = inlined_call_operand.hbm [shape: f32[2,8,32], index: 3, kind: output, shape index: {}]  }
   0x1   :  { %10 = vsyncpa [#allocation3 + $0x1], 0 }
   0x2   :  { %11 = vsyncpa [#allocation6], 0 }
   0x3   :  { %12 = vsyncpa [#allocation4], 0 }
   0x4   :  { %14 = vsyncpa [#allocation4 + $0x1], 0  ;;  %s765_s12 = smov 0   ;;  %s767_s13 = smov 0  }
   0x5   :  { %s769_s14 = smov 0   ;;  %s771_s15 = smov 0  }
   0x6   :  { %s773_s16 = smov 0   ;;  %s775_s17 = smov 0  }
   0x7 LB: > { %s434_s18 = sadd.s32 4294967295, %s734_s17   ;;  %s435_s19 = sadd.s32 4294967294, %s734_s17   ;;  %s734_s17 = sphi %s775_s17, %s20_s17   ;;  %s730_s16 = sphi %s773_s16, %s1040_s16   ;;  %s726_s15 = sphi %s771_s15, %s1039_s15   ;;  %s722_s14 = sphi %s769_s14, %s1038_s14   ;;  %s718_s13 = sphi %s767_s13, %s1037_s13   ;;  %s714_s12 = sphi %s765_s12, %s1036_s12  }
   0x8   : > { %p54_p0 = scmp.ne.s32.totalorder %s718_s13, %s714_s12  ;;  %p799_p1 = scmp.eq.s32.totalorder %s434_s18, 0 }
   0x9   : > { %p803_p2 = scmp.eq.s32.totalorder %s434_s18, 1  ;;  %p133_p3 = scmp.eq.s32.totalorder %s435_s19, 1 }
   0xa   : > { %s1023_s20 = scalar_select %p799_p1, 1, 0 }
   0xb   : > { %p809_p4 = por %p799_p1, %p54_p0  ;;  %p436_p5 = scmp.ge.s32.totalorder %s734_s17, 1 }
   0xc   : > { %p814_p6 = por %p133_p3, %p54_p0  ;;  %p140_p7 = scmp.lt.s32.totalorder %s734_s17, 3 }
   0xd   : > { %s1025_s22 = scalar_select %p809_p4, 1, 0 }
   0xe   : > { %s1026_s23 = scalar_select %p814_p6, 1, 0 }
   0xf   : > { %p819_p8 = pnand %p436_p5, %p140_p7  ;;  %s736_s25 = smov [#allocation5]  }
  0x10   : > { %s152_s26 = sshll.u32 %s736_s25, 4  ;;  %s737_s28 = smov [#allocation7]   ;;  %s823_s26 = int_to_ptr.vmem [resolvable:$true] %s152_s26 }
  0x11   : > { %p486_p9 = pneg %p819_p8  ;;  %s168_s29 = sshll.u32 %s737_s28, 4  ;;  %s834_s29 = int_to_ptr.vmem [resolvable:$true] %s168_s29 }
  0x12   : > { %s562_s5 = scalar_lea.hbm %s1016_s1, 512 }
  0x13   : > { %p830_p11 = pnand %p486_p9, %p799_p1  ;;  %p563_p12 = scmp.ne.s32.totalorder %s1016_s1, %s562_s5 }
  0x14   : > { %p569_p5 = scmp.lt.u32.totalorder %s562_s5, %s1016_s1 }
  0x15   : > { %p564_p13 = pneg %p830_p11 }
  0x17   : > { %p565_p0 = pnand %p564_p13, %p563_p12 }
  0x19   : > { %p566_p3 = pneg %p565_p0 }
  0x1b   : > { %p571_p7 = pnand %p569_p5, %p566_p3 }
  0x1d   : > { %574 = shalt.err (!%p571_p7)
}
  0x1e   : > { %s575_s10 = scalar_lea.vmem %s823_s26, 512  ;;  %p583_p1 = scmp.lt.s32.totalorder %s823_s26, %s823_s26 }
  0x1f   : > { %p576_p9 = scmp.ne.s32.totalorder %s823_s26, %s575_s10  ;;  %p584_p12 = scmp.lt.s32.totalorder %s575_s10, %s575_s10 }
  0x21   : > { %p578_p10 = pnand %p576_p9, %p564_p13  ;;  %p585_p0 = por %p584_p12, %p583_p1 }
  0x23   : > { %p579_p6 = pneg %p578_p10 }
  0x25   : > { %p586_p4 = pnand %p585_p0, %p579_p6 }
  0x27   : > { %589 = shalt.err (!%p586_p4)
}
  0x28   : > { %s738_s11 = smov 128   ;;  %s739_s18 = smov 8  }
  0x29   : > { %489 = dma.hbm_to_vmem [thread:$0]  (!%p830_p11), %s1016_s1, 512, %s823_s26, [#allocation6], %s738_s11, %s738_s11, %s739_s18  }
  0x2a   : > { %s590_s4 = scalar_lea.hbm %s1017_s2, 128 }
  0x2b   : > { %p591_p1 = scmp.ne.s32.totalorder %s1017_s2, %s590_s4  ;;  %p597_p10 = scmp.lt.u32.totalorder %s590_s4, %s1017_s2 }
  0x2d   : > { %p593_p4 = pnand %p591_p1, %p564_p13 }
  0x2f   : > { %p594_p6 = pneg %p593_p4 }
  0x31   : > { %p599_p3 = pnand %p597_p10, %p594_p6 }
  0x33   : > { %602 = shalt.err (!%p599_p3)
}
  0x34   : > { %s603_s26 = scalar_lea.vmem %s834_s29, 128  ;;  %p611_p12 = scmp.lt.s32.totalorder %s834_s29, %s834_s29 }
  0x35   : > { %p604_p5 = scmp.ne.s32.totalorder %s834_s29, %s603_s26  ;;  %p612_p0 = scmp.lt.s32.totalorder %s603_s26, %s603_s26 }
  0x37   : > { %p606_p7 = pnand %p604_p5, %p564_p13  ;;  %p613_p1 = por %p612_p0, %p611_p12 }
  0x39   : > { %p607_p9 = pneg %p606_p7 }
  0x3b   : > { %p614_p4 = pnand %p613_p1, %p607_p9 }
  0x3d   : > { %617 = shalt.err (!%p614_p4)
}
  0x3e   : > { %492 = dma.hbm_to_vmem [thread:$0]  (!%p830_p11), %s1017_s2, 128, %s834_s29, [#allocation6]  }
  0x3f   : > { %s29_s11 = sadd.s32 1, %s730_s16  ;;  %s41_s18 = sadd.s32 1, %s722_s14 }
  0x40   : > { %p30_p13 = scmp.ge.s32.totalorder %s29_s11, 2  ;;  %p48_p6 = scmp.ne.s32.totalorder %s722_s14, %s718_s13 }
  0x41   : > { %p49_p10 = scmp.eq.s32.totalorder %s734_s17, 0  ;;  %p503_p3 = scmp.lt.s32.totalorder %s734_s17, 2 }
  0x42   : > { %s1042_s11 = smov (%p30_p13, %s29_s11), 0  ;;  %p898_p7 = por %p803_p2, %p48_p6 }
  0x43   : > { %p50_p5 = por %p49_p10, %p48_p6  ;;  %s36_s19 = ssub.s32 %s730_s16, %s1042_s11 }
  0x44   : > { %s1029_s27 = scalar_select %p898_p7, 1, 0 }
  0x45   : > { %s179_s25 = sand.u32 1, %s722_s14   ;;  %p39_p9 = scmp.eq.s32.totalorder %s36_s19, 0 }
  0x46   : > { %s440_s29 = sshll.u32 %s179_s25, 3  ;;  %s441_s28 = sshll.u32 %s730_s16, 7 }
  0x47   : > { %s907_s30 = scalar_select %p39_p9, %s722_s14, %s41_s18  }
  0x48   : > { %s912_s6 = scalar_lea.hbm %s1015_s0, %s441_s28  ;;  %s183_s21 = scalar_lea.vmem [#allocation2], %s440_s29 }
  0x49   : > { %s191_s7 = sshll.u32 %s183_s21, 4  ;;  %p916_p2 = pnand %p503_p3, %p50_p5  ;;  %s920_s7 = int_to_ptr.vmem [resolvable:$true] %s191_s7 }
  0x4a   : > { %s180_s26 = scalar_lea.sflag [#allocation3], %s179_s25  ;;  %s618_s9 = scalar_lea.hbm %s912_s6, 128 }
  0x4b   : > { %p619_p11 = scmp.ne.s32.totalorder %s912_s6, %s618_s9  ;;  %p620_p12 = pneg %p916_p2 }
  0x4c   : > { %s623_s19 = scalar_lea.hbm %s1015_s0, 256  ;;  %p624_p4 = scmp.lt.u32.totalorder %s912_s6, %s1015_s0 }
  0x4d   : > { %p621_p0 = pnand %p620_p12, %p619_p11  ;;  %p625_p13 = scmp.lt.u32.totalorder %s623_s19, %s618_s9 }
  0x4e   : > { %p627_p10 = scmp.lt.u32.totalorder %s618_s9, %s912_s6 }
  0x4f   : > { %p622_p1 = pneg %p621_p0  ;;  %p626_p6 = por %p625_p13, %p624_p4 }
  0x51   : > { %p628_p3 = por %p627_p10, %p626_p6 }
  0x53   : > { %p629_p5 = pnand %p628_p3, %p622_p1 }
  0x55   : > { %632 = shalt.err (!%p629_p5)
}
  0x56   : > { %s633_s25 = scalar_lea.vmem %s920_s7, 128  ;;  %s740_s4 = smov [#allocation2]  }
  0x57   : > { %p634_p9 = scmp.ne.s32.totalorder %s920_s7, %s633_s25  ;;  %s638_s5 = sshll.u32 %s740_s4, 4  ;;  %s639_s5 = int_to_ptr.vmem [resolvable:$false] %s638_s5 }
  0x58   : > { %s640_s21 = scalar_lea.vmem %s639_s5, 256  ;;  %p641_p7 = scmp.lt.s32.totalorder %s920_s7, %s639_s5 }
  0x59   : > { %p636_p11 = pnand %p634_p9, %p620_p12  ;;  %p642_p4 = scmp.lt.s32.totalorder %s640_s21, %s633_s25 }
  0x5b   : > { %p637_p0 = pneg %p636_p11  ;;  %p643_p13 = por %p642_p4, %p641_p7 }
  0x5d   : > { %p644_p6 = pnand %p643_p13, %p637_p0 }
  0x5f   : > { %647 = shalt.err (!%p644_p6)
}
  0x60   : > { %496 = dma.hbm_to_vmem [thread:$0]  (!%p916_p2), %s912_s6, 128, %s920_s7, %s180_s26  }
  0x61   : > { %200 = sbr.rel (%p819_p8) target bundleno = 347 (0x15b), region = 32  ;;  %s950_s9 = sand.u32 (!%p819_p8), 1, %s718_s13  }
  0x62   : > { %s443_s10 = sshll.u32 (!%p819_p8), %s950_s9, 3  ;;  %s203_s18 = scalar_lea.sflag (!%p819_p8), [#allocation3], %s950_s9 }
  0x63   : > { %s206_s19 = scalar_lea.vmem (!%p819_p8), [#allocation2], %s443_s10  ;;  %p1031_p7 = scmp.ne.s32.totalorder (!%p819_p8), %s1025_s22, 0 }
  0x68   : > { %701 = dma.done.wait (%p1031_p7), %s203_s18, 128  }
  0x69   : > { %703 = vsyncadd (%p1031_p7), %s203_s18, 4294967168  ;;  %p1032_p12 = scmp.ne.s32.totalorder %s1023_s20, 0 }
  0x6b   : > { %705 = dma.done.wait (%p1032_p12), [#allocation6], 640  }
  0x6c   : > { %707 = vsyncadd (%p1032_p12), [#allocation6], 4294966656  ;;  %v741_v0 = vmov 0.0|0.0   ;;  %vm742_vm0 = vmmov 0   ;;  %v743_v1 = vmov 0.0   ;;  %v238_v2 = vld [vmem:[#allocation5] sm:$0xff] }
  0x6d   : > { %468 = vmatprep.subr.bf16.mxu0 %v741_v0  ;;  %465 = vmatprep.mubr.msk.f32.mxu0 %vm742_vm0, %v743_v1  ;;  %v239_v3 = vld [vmem:[#allocation5 + $0x8] sm:$0xff]  ;;  %v240_v4 = vld [vmem:[#allocation5 + $0x10] sm:$0xff]  ;;  %v241_v6 = vld [vmem:[#allocation5 + $0x18] sm:$0xff]  ;;  %vm243_vm1 = vcmask 261120   ;;  %s449_s20 = sshll.u32 %s726_s15, 7  ;;  %s236_s22 = scalar_lea.vmem [#allocation8], %s443_s10 }
  0x6e   : > { %v469_v5 = vpack.c.bf16 %v239_v3, %v238_v2  ;;  %v472_v7 = vpack.c.bf16 %v241_v6, %v240_v4  ;;  %v237_v8 = vld [vmem:[%s206_s19] sm:$0xff]  ;;  %v242_v9 = vld [vmem:[#allocation7] sm:$0xff]  ;;  %s333_s24 = sshll.u32 %s236_s22, 4  ;;  %s966_s8 = scalar_lea.hbm %s1018_s3, %s449_s20  ;;  %s968_s24 = int_to_ptr.vmem [resolvable:$true] %s333_s24 }
  0x6f   : > { %s319_s26 = scalar_lea.sflag [#allocation4], %s950_s9  ;;  %s648_s29 = scalar_lea.vmem %s968_s24, 128 }
  0x70   : > { %470 = vmatpush3.bf16.msra.mxu0 %v469_v5  ;;  %p649_p8 = scmp.ne.s32.totalorder %s968_s24, %s648_s29  ;;  %p1033_p2 = scmp.ne.s32.totalorder %s1029_s27, 0 }
  0x71   : > { %471 = vmatprep.subr.bf16.mxu0 %v741_v0  ;;  %s744_s15 = smov [#allocation8]  }
  0x72   : > { %p650_p1 = pnand %p649_p8, %p1033_p2  ;;  %s652_s28 = sshll.u32 %s744_s15, 4  ;;  %s653_s28 = int_to_ptr.vmem [resolvable:$false] %s652_s28 }
  0x73   : > { %s654_s25 = scalar_lea.vmem %s653_s28, 256  ;;  %p655_p3 = scmp.lt.s32.totalorder %s968_s24, %s653_s28 }
  0x74   : > { %473 = vmatpush3.bf16.msra.mxu0 %v472_v7  ;;  %p651_p10 = pneg %p650_p1  ;;  %p656_p5 = scmp.lt.s32.totalorder %s654_s25, %s648_s29 }
  0x76   : > { %p657_p9 = por %p656_p5, %p655_p3 }
  0x77   : > { %466 = vmatmul.mubr.msk.f32.vlgmr.msra.gmra.mrb[0].mxu0 %vm243_vm1, %v237_v8 }
  0x78   : > { %p658_p11 = pnand %p657_p9, %p651_p10 }
 0x14a   : > { %v313_v10 = vpop.f32.mrb[0].mxu0 }
 0x14b   : > { %v314_v11 = vadd.f32 %v313_v10, %v242_v9  ;;  %v467_v12 = vpop.f32.mrb[1].mxu0 }
 0x14d   : > { %317 = vst.msk [vmem:[%s236_s22] sm:$0xff] %vm243_vm1, %v314_v11 }
 0x14e   : > { %661 = shalt.err (!%p658_p11)
}
 0x14f   : > { %s662_s4 = scalar_lea.hbm %s966_s8, 128  ;;  %s666_s9 = scalar_lea.hbm %s1018_s3, 256 }
 0x150   : > { %p663_p0 = scmp.ne.s32.totalorder %s966_s8, %s662_s4  ;;  %p667_p6 = scmp.lt.u32.totalorder %s966_s8, %s1018_s3 }
 0x151   : > { %p668_p7 = scmp.lt.u32.totalorder %s666_s9, %s662_s4  ;;  %p670_p8 = scmp.lt.u32.totalorder %s662_s4, %s966_s8 }
 0x152   : > { %p664_p4 = pnand %p663_p0, %p1033_p2 }
 0x153   : > { %p669_p12 = por %p668_p7, %p667_p6 }
 0x154   : > { %p665_p13 = pneg %p664_p4 }
 0x155   : > { %p671_p1 = por %p670_p8, %p669_p12 }
 0x157   : > { %p672_p10 = pnand %p671_p1, %p665_p13 }
 0x159   : > { %675 = shalt.err (!%p672_p10)
}
 0x15a   : > { %484 = dma.vmem_to_hbm [thread:$0]  (%p1033_p2), %s968_s24, 128, %s966_s8, %s319_s26  }
 0x15b PF: > { %s345_s19 = sand.u32 1, %s714_s12   ;;  %p1034_p3 = scmp.ne.s32.totalorder %s1026_s23, 0 }
 0x15c   : > { %p1035_p5 = scmp.ge.s32.totalorder %s734_s17, 2  ;;  %s346_s20 = scalar_lea.sflag [#allocation4], %s345_s19 }
 0x15e   : > { %p498_p9 = pnand %p1035_p5, %p1034_p3 }
 0x160   : > { %709 = dma.done.wait (!%p498_p9), %s346_s20, 128  }
 0x161   : > { %711 = vsyncadd (!%p498_p9), %s346_s20, 4294967168  ;;  %s20_s17 = sadd.s32 1, %s734_s17   ;;  %s1036_s12 = smov %s718_s13 }
 0x162   : > { %p17_p11 = scmp.ge.s32.totalorder %s20_s17, 4   ;;  %s1037_s13 = smov %s722_s14 }
 0x163   : > { %s1038_s14 = smov %s907_s30  ;;  %s1039_s15 = smov %s730_s16 }
 0x164   : > { %s1040_s16 = smov %s1042_s11  ;;  %19 = sbr.rel (!%p17_p11) target bundleno = 7 (0x7), region = 86 }
 0x16b   :  { %351 = vsyncpa [#allocation3], 1 }
 0x16c   :  { %353 = vsyncpa [#allocation3 + $0x1], 1 }
 0x16d   :  { %354 = vsyncpa [#allocation6], 1 }
 0x16e   :  { %355 = vsyncpa [#allocation4], 1 }
 0x16f   :  { %357 = vsyncpa [#allocation4 + $0x1], 1 }

</bundles_post_ra>
